<compile_context>
chip_gen: v5e
topology: v5e:2x2
jax: 0.10.0
libtpu: 0.0.40
codegen_flags: <defaults>
</compile_context>

<pallas_src>
import functools

import jax
import jax.numpy as jnp
from jax import lax
from jax.experimental import pallas as pl
from jax.experimental.pallas import tpu as pltpu


def _round_up(n, m):
    return ((n + m - 1) // m) * m


def _mlp_kernel(x_ref, w1_ref, b1_ref, w2t_ref, b2_ref, o_ref):
    # x_ref: (TILE_B, 25)  w1_ref: (25, 20)  b1_ref: (1, 20)
    # w2t_ref: (1, 20)     b2_ref: (1, 1)    o_ref: (1, TILE_B)
    x = x_ref[...]
    h = jnp.dot(x, w1_ref[...], preferred_element_type=jnp.float32)  # (TILE_B, 20)
    h = jnp.maximum(h + b1_ref[...], 0.0)                            # bias + ReLU
    # Second layer as (1,20) . (TILE_B,20)^T -> (1, TILE_B): the result is
    # already lane-dense, so writeback is unmasked full-lane vst instead of a
    # masked-store stream of a (TILE_B, 1) column.
    o = lax.dot_general(
        w2t_ref[...], h,
        dimension_numbers=(((1,), (1,)), ((), ())),
        preferred_element_type=jnp.float32)                          # (1, TILE_B)
    o_ref[...] = (o + b2_ref[...]).astype(o_ref.dtype)


@functools.partial(jax.jit, static_argnames=("tile_b",))
def ann_simple_forward(x, w1, b1, w2t, b2, *, tile_b=1024):
    """x: (B, 25) or (25,) f32 -> (B,) f32 (0-d when B == 1), like torch .squeeze()."""
    x = jnp.asarray(x, jnp.float32)
    if x.ndim == 1:                      # unbatched input, like nn.Linear((25,))
        x = x[None, :]
    B = x.shape[0]

    # Lane-width tiles (multiple of 128) so the output block is lane-dense;
    # clamp for tiny batches so we don't pad B=8 up to 1024 rows.
    tile_b = min(tile_b, _round_up(B, 128))
    b_pad = _round_up(B, tile_b)
    num_tiles = b_pad // tile_b
    if b_pad != B:
        x = jnp.pad(x, ((0, b_pad - B), (0, 0)))

    out = pl.pallas_call(
        _mlp_kernel,
        out_shape=jax.ShapeDtypeStruct((1, b_pad), jnp.float32),
        grid=(num_tiles,),
        in_specs=[
            # x: streamed over the batch, auto double-buffered by Pallas.
            pl.BlockSpec((tile_b, 25), lambda i: (i, 0)),
            # Parameters: constant block index -> fetched once, VMEM-resident.
            pl.BlockSpec((25, 20), lambda i: (0, 0)),
            pl.BlockSpec((1, 20), lambda i: (0, 0)),
            pl.BlockSpec((1, 20), lambda i: (0, 0)),
            pl.BlockSpec((1, 1), lambda i: (0, 0)),
        ],
        out_specs=pl.BlockSpec((1, tile_b), lambda i: (0, i)),
        compiler_params=pltpu.CompilerParams(
            dimension_semantics=("parallel",),  # megacore sharding on v7x
        ),
    )(x, w1, b1, w2t, b2)

    out = out.reshape(b_pad)[:B]
    return jnp.squeeze(out)  # (B,) -> scalar when B == 1, matching torch .squeeze()


def init_params(key):
    """Deterministic init mirroring nn.Linear defaults: U(-1/sqrt(fan_in), 1/sqrt(fan_in))."""
    k1, k2, k3, k4 = jax.random.split(key, 4)
    bound1 = 1.0 / jnp.sqrt(25.0)
    bound2 = 1.0 / jnp.sqrt(20.0)
    w1 = jax.random.uniform(k1, (25, 20), jnp.float32, -bound1, bound1)   # linear1.weight.T
    b1 = jax.random.uniform(k2, (1, 20), jnp.float32, -bound1, bound1)
    w2t = jax.random.uniform(k3, (1, 20), jnp.float32, -bound2, bound2)   # linear2.weight (torch layout)
    b2 = jax.random.uniform(k4, (1, 1), jnp.float32, -bound2, bound2)
    return w1, b1, w2t, b2


if __name__ == "__main__":
    key = jax.random.PRNGKey(0)
    k_x, k_x2, k_p = jax.random.split(key, 3)

    w1, b1, w2t, b2 = init_params(k_p)

    def reference(x):
        h = jnp.maximum(
            jnp.dot(x, w1, precision=lax.Precision.HIGHEST) + b1, 0.0)
        o = jnp.dot(h, w2t.T, precision=lax.Precision.HIGHEST) + b2
        return jnp.squeeze(o)

    # Small batch (single tile).
    B = 8
    x = jax.random.normal(k_x, (B, 25), dtype=jnp.float32)
    out = jax.block_until_ready(ann_simple_forward(x, w1, b1, w2t, b2))
    assert out.shape == (B,), out.shape
    assert jnp.allclose(out, reference(x), atol=1e-4, rtol=1e-4)

    # Multi-tile path: 3 grid steps + padded tail (B=300 -> b_pad=384).
    B2 = 300
    x2 = jax.random.normal(k_x2, (B2, 25), dtype=jnp.float32)
    out2 = jax.block_until_ready(
        ann_simple_forward(x2, w1, b1, w2t, b2, tile_b=128))
    assert out2.shape == (B2,), out2.shape
    assert jnp.allclose(out2, reference(x2), atol=1e-4, rtol=1e-4)

    print("KERNEL_OK")
</pallas_src>

<mosaic_0001>
module attributes {stable_mosaic.version = 11 : i64} {
  func.func @_mlp_kernel(%arg0: i32, %arg1: memref<128x25xf32, #tpu.memory_space<vmem>>, %arg2: memref<25x20xf32, #tpu.memory_space<vmem>>, %arg3: memref<1x20xf32, #tpu.memory_space<vmem>>, %arg4: memref<1x20xf32, #tpu.memory_space<vmem>>, %arg5: memref<1x1xf32, #tpu.memory_space<vmem>>, %arg6: memref<1x128xf32, #tpu.memory_space<vmem>>) attributes {dimension_semantics = [#tpu.dimension_semantics<parallel>], iteration_bounds = array<i64: 1>, scalar_prefetch = 0 : i64, scratch_operands = 0 : i64, tpu.core_type = #tpu.core_type<tc>, window_params = [{transform_indices = @transform_0, window_bounds = array<i64: 128, 25>}, {pipeline_mode = #tpu.pipeline_mode<synchronous>, transform_indices = @transform_1, window_bounds = array<i64: 25, 20>}, {pipeline_mode = #tpu.pipeline_mode<synchronous>, transform_indices = @transform_2, window_bounds = array<i64: 1, 20>}, {pipeline_mode = #tpu.pipeline_mode<synchronous>, transform_indices = @transform_3, window_bounds = array<i64: 1, 20>}, {pipeline_mode = #tpu.pipeline_mode<synchronous>, transform_indices = @transform_4, window_bounds = array<i64: 1, 1>}, {transform_indices = @transform_5, window_bounds = array<i64: 1, 128>}]} {
    %c0 = arith.constant 0 : index
    %c0_0 = arith.constant 0 : index
    %0 = vector.load %arg1[%c0, %c0_0] : memref<128x25xf32, #tpu.memory_space<vmem>>, vector<128x25xf32>
    %c0_1 = arith.constant 0 : index
    %c0_2 = arith.constant 0 : index
    %1 = vector.load %arg2[%c0_1, %c0_2] : memref<25x20xf32, #tpu.memory_space<vmem>>, vector<25x20xf32>
    %cst = arith.constant dense<0.000000e+00> : vector<128x20xf32>
    %2 = tpu.matmul %0, %1, %cst {dimension_numbers = #tpu.dot_dimension_numbers<[1], [0], [0], [1], [0, 0, 1, 1], [], []>} : vector<128x25xf32>, vector<25x20xf32>, vector<128x20xf32> -> vector<128x20xf32>
    %c0_3 = arith.constant 0 : index
    %c0_4 = arith.constant 0 : index
    %3 = vector.load %arg3[%c0_3, %c0_4] : memref<1x20xf32, #tpu.memory_space<vmem>>, vector<1x20xf32>
    %4 = vector.broadcast %3 : vector<1x20xf32> to vector<128x20xf32>
    %5 = arith.addf %2, %4 : vector<128x20xf32>
    %cst_5 = arith.constant 0.000000e+00 : f32
    %6 = vector.broadcast %cst_5 : f32 to vector<128x20xf32>
    %7 = arith.maximumf %5, %6 : vector<128x20xf32>
    %c0_6 = arith.constant 0 : index
    %c0_7 = arith.constant 0 : index
    %8 = vector.load %arg4[%c0_6, %c0_7] : memref<1x20xf32, #tpu.memory_space<vmem>>, vector<1x20xf32>
    %cst_8 = arith.constant dense<0.000000e+00> : vector<1x128xf32>
    %9 = tpu.matmul %8, %7, %cst_8 {dimension_numbers = #tpu.dot_dimension_numbers<[1], [1], [0], [0], [0, 0, 1, 0], [], []>} : vector<1x20xf32>, vector<128x20xf32>, vector<1x128xf32> -> vector<1x128xf32>
    %c0_9 = arith.constant 0 : index
    %c0_10 = arith.constant 0 : index
    %10 = vector.load %arg5[%c0_9, %c0_10] : memref<1x1xf32, #tpu.memory_space<vmem>>, vector<1x1xf32>
    %11 = vector.broadcast %10 : vector<1x1xf32> to vector<1x128xf32>
    %12 = arith.addf %9, %11 : vector<1x128xf32>
    %c0_11 = arith.constant 0 : index
    %c0_12 = arith.constant 0 : index
    %13 = vector.load %arg6[%c0_11, %c0_12] : memref<1x128xf32, #tpu.memory_space<vmem>>, vector<1x128xf32>
    tpu.vector_store %arg6[%c0_11, %c0_12], %12 {strides = array<i32>} : memref<1x128xf32, #tpu.memory_space<vmem>>, vector<1x128xf32>,
    return
  }
  func.func @transform_0(%arg0: i32) -> (i32, i32) {
    %c0_i32 = arith.constant 0 : i32
    %c0_i32_0 = arith.constant 0 : i32
    return %arg0, %c0_i32 : i32, i32
  }
  func.func @transform_1(%arg0: i32) -> (i32, i32) {
    %c0_i32 = arith.constant 0 : i32
    %c0_i32_0 = arith.constant 0 : i32
    %c0_i32_1 = arith.constant 0 : i32
    return %c0_i32, %c0_i32_0 : i32, i32
  }
  func.func @transform_2(%arg0: i32) -> (i32, i32) {
    %c0_i32 = arith.constant 0 : i32
    %c0_i32_0 = arith.constant 0 : i32
    %c0_i32_1 = arith.constant 0 : i32
    return %c0_i32, %c0_i32_0 : i32, i32
  }
  func.func @transform_3(%arg0: i32) -> (i32, i32) {
    %c0_i32 = arith.constant 0 : i32
    %c0_i32_0 = arith.constant 0 : i32
    %c0_i32_1 = arith.constant 0 : i32
    return %c0_i32, %c0_i32_0 : i32, i32
  }
  func.func @transform_4(%arg0: i32) -> (i32, i32) {
    %c0_i32 = arith.constant 0 : i32
    %c0_i32_0 = arith.constant 0 : i32
    %c0_i32_1 = arith.constant 0 : i32
    return %c0_i32, %c0_i32_0 : i32, i32
  }
  func.func @transform_5(%arg0: i32) -> (i32, i32) {
    %c0_i32 = arith.constant 0 : i32
    %c0_i32_0 = arith.constant 0 : i32
    return %c0_i32, %arg0 : i32, i32
  }
}

</mosaic_0001>

<bundles_post_ra>
// kernel: ann_simple_forward.1
= control target key start
LH: loop header
LB: loop body
LE: loop exit
PB: predicated region body
PF: predicated region fallthrough
CT: control target
= control target key end

     0   :  { %vm95_vm0 = vcmask 1040384   ;;  %vm46_vm1 = vcmask 203776   ;;  %vm188_vm2 = vcmask 162816   ;;  %v310_v58 = vmov 0   ;;  %s449_s1 = inlined_call_operand.vmem [shape: f32[25,20], index: 1, kind: input, shape index: {}]   ;;  %s450_s0 = inlined_call_operand.vmem [shape: f32[128,25], index: 0, kind: input, shape index: {}]   ;;  %s451_s2 = inlined_call_operand.vmem [shape: f32[1,20], index: 2, kind: input, shape index: {}]   ;;  %s452_s4 = inlined_call_operand.<no memory space> [shape: f32[1,1], index: 4, kind: input, shape index: {}]   ;;  %s453_s3 = inlined_call_operand.vmem [shape: f32[1,20], index: 3, kind: input, shape index: {}]   ;;  %s454_s5 = inlined_call_operand.vmem [shape: f32[1,128], index: 5, kind: output, shape index: {}]  }
   0x1   :  { %v41_v0 = vld [vmem:[%s449_s1 + $0x18] sm:$0x1]  ;;  %v40_v1 = vld [vmem:[%s449_s1 + $0x10] sm:$0xff]  ;;  %v39_v2 = vld [vmem:[%s449_s1 + $0x8] sm:$0xff]  ;;  %v10_v56 = vstv %s452_s4  ;;  %308 = vset.pattern.permute.xlu0 %v310_v58 }
   0x2   :  { %299 = vmatpush.msk.msra.mxu2 %vm95_vm0, %v41_v0  ;;  %300 = vmatpush.msk.msra.mxu3 %vm95_vm0, %v41_v0  ;;  %v38_v3 = vld [vmem:[%s449_s1] sm:$0xff]  ;;  %v28_v4 = vld [vmem:[%s450_s0 + $0x30] sm:$0xff]  ;;  %v29_v7 = vld [vmem:[%s450_s0 + $0x38] sm:$0xff]  ;;  %11 = vst [vmem:[#allocation2] sm:$0x1] %v10_v56 }
   0x3   :  { %265 = vmatpush.msk.msra.mxu0 %vm95_vm0, %v41_v0  ;;  %v34_v5 = vld [vmem:[%s450_s0 + $0x60] sm:$0xff]  ;;  %v35_v8 = vld [vmem:[%s450_s0 + $0x68] sm:$0xff]  ;;  %v36_v11 = vld [vmem:[%s450_s0 + $0x70] sm:$0xff] }
   0x4   :  { %301 = vmatpush.msra.mxu2 %v40_v1  ;;  %302 = vmatpush.msra.mxu3 %v40_v1  ;;  %v22_v6 = vld [vmem:[%s450_s0] sm:$0xff]  ;;  %v23_v9 = vld [vmem:[%s450_s0 + $0x8] sm:$0xff]  ;;  %v24_v12 = vld [vmem:[%s450_s0 + $0x10] sm:$0xff] }
   0x5   :  { %112 = vmatpush.msra.mxu0 %v40_v1  ;;  %v30_v10 = vld [vmem:[%s450_s0 + $0x40] sm:$0xff]  ;;  %v31_v13 = vld [vmem:[%s450_s0 + $0x48] sm:$0xff]  ;;  %v37_v14 = vld [vmem:[%s450_s0 + $0x78] sm:$0xff] }
   0x6   :  { %303 = vmatpush.msra.mxu2 %v39_v2  ;;  %304 = vmatpush.msra.mxu3 %v39_v2  ;;  %v25_v15 = vld [vmem:[%s450_s0 + $0x18] sm:$0xff]  ;;  %v32_v16 = vld [vmem:[%s450_s0 + $0x50] sm:$0xff]  ;;  %v26_v17 = vld [vmem:[%s450_s0 + $0x20] sm:$0xff] }
   0x7   :  { %113 = vmatpush.msra.mxu0 %v39_v2  ;;  %v33_v18 = vld [vmem:[%s450_s0 + $0x58] sm:$0xff]  ;;  %v27_v19 = vld [vmem:[%s450_s0 + $0x28] sm:$0xff]  ;;  %v309_v28 = vld [vmem:[%s451_s2] ss:$0 sm:$0xff] }
   0x8   :  { %305 = vmatpush.msra.mxu2 %v38_v3  ;;  %306 = vmatpush.msra.mxu3 %v38_v3 }
   0x9   :  { %272 = vmatmul.msk.f32.vlgmr.msra.gmra.mxu2 %vm46_vm1, %v28_v4  ;;  %278 = vmatmul.msk.f32.vlgmr.msra.gmra.mxu3 %vm46_vm1, %v34_v5  ;;  %v181_v62 = vld [vmem:[#allocation2] sm:$0x1] }
   0xa   :  { %114 = vmatpush.msra.mxu0 %v38_v3  ;;  %184 = vperm.xlu0 %308, %v181_v62  }
   0xb   :  { %266 = vmatmul.msk.f32.vlgmr.msra.gmra.mxu0 %vm46_vm1, %v22_v6 }
  0x11   :  { %273 = vmatmul.msk.f32.gmra.mxu2 %vm46_vm1, %v29_v7  ;;  %279 = vmatmul.msk.f32.gmra.mxu3 %vm46_vm1, %v35_v8  ;;  %v180_v8 = vld [vmem:[%s453_s3] sm:$0x1] }
  0x13   :  { %267 = vmatmul.msk.f32.gmra.mxu0 %vm46_vm1, %v23_v9 }
  0x19   :  { %274 = vmatmul.msk.f32.gmra.mxu2 %vm46_vm1, %v30_v10  ;;  %280 = vmatmul.msk.f32.gmra.mxu3 %vm46_vm1, %v36_v11 }
  0x1b   :  { %268 = vmatmul.msk.f32.gmra.mxu0 %vm46_vm1, %v24_v12 }
  0x21   :  { %275 = vmatmul.msk.f32.gmra.mxu2 %vm46_vm1, %v31_v13  ;;  %281 = vmatmul.msk.f32.gmra.mxu3 %vm46_vm1, %v37_v14 }
  0x23   :  { %269 = vmatmul.msk.f32.gmra.mxu0 %vm46_vm1, %v25_v15 }
  0x29   :  { %276 = vmatmul.msk.f32.gmra.mxu2 %vm46_vm1, %v32_v16 }
  0x2b   :  { %270 = vmatmul.msk.f32.gmra.mxu0 %vm46_vm1, %v26_v17 }
  0x31   :  { %277 = vmatmul.msk.f32.gmra.mxu2 %vm46_vm1, %v33_v18 }
  0x33   :  { %271 = vmatmul.msk.f32.gmra.mxu0 %vm46_vm1, %v27_v19 }
  0x7c   :  { %v185_v9 = vpop.permute.xlu0 %184 }
  0x7d   :  { %v187_v10 = vperm.slane %v185_v9, 0 }
  0x88   :  { %v417_v22 = vpop.f32.mrf.mxu0 }
  0x89   :  { %v117_v5 = vadd.f32 %v309_v28, %v417_v22 }
  0x8b   :  { %v164_v7 = vmax.f32 %v117_v5, 0.0 }
  0x8c   :  { %v134_v20 = vpop.f32.mrf.mxu2  ;;  %v152_v21 = vpop.f32.mrf.mxu3 }
  0x8d   :  { %v153_v38 = vadd.f32 %v309_v28, %v152_v21  ;;  %v135_v54 = vadd.f32 %v309_v28, %v134_v20 }
  0x8f   :  { %v176_v41 = vmax.f32 %v153_v38, 0.0  ;;  %v170_v59 = vmax.f32 %v135_v54, 0.0 }
  0x90   :  { %v119_v27 = vpop.f32.mrf.mxu0 }
  0x91   :  { %v120_v3 = vadd.f32 %v309_v28, %v119_v27 }
  0x93   :  { %v165_v6 = vmax.f32 %v120_v3, 0.0 }
  0x94   :  { %v137_v23 = vpop.f32.mrf.mxu2  ;;  %v155_v24 = vpop.f32.mrf.mxu3 }
  0x95   :  { %v156_v35 = vadd.f32 %v309_v28, %v155_v24  ;;  %v138_v51 = vadd.f32 %v309_v28, %v137_v23 }
  0x97   :  { %v177_v39 = vmax.f32 %v156_v35, 0.0  ;;  %v171_v55 = vmax.f32 %v138_v51, 0.0 }
  0x98   :  { %v122_v34 = vpop.f32.mrf.mxu0 }
  0x99   :  { %v123_v1 = vadd.f32 %v309_v28, %v122_v34 }
  0x9b   :  { %v166_v4 = vmax.f32 %v123_v1, 0.0 }
  0x9c   :  { %v140_v25 = vpop.f32.mrf.mxu2  ;;  %v158_v26 = vpop.f32.mrf.mxu3 }
  0x9d   :  { %v159_v32 = vadd.f32 %v309_v28, %v158_v26  ;;  %v141_v49 = vadd.f32 %v309_v28, %v140_v25 }
  0x9f   :  { %v178_v36 = vmax.f32 %v159_v32, 0.0  ;;  %v172_v52 = vmax.f32 %v141_v49, 0.0 }
  0xa0   :  { %v125_v40 = vpop.f32.mrf.mxu0 }
  0xa1   :  { %v126_v63 = vadd.f32 %v309_v28, %v125_v40 }
  0xa3   :  { %v167_v2 = vmax.f32 %v126_v63, 0.0 }
  0xa4   :  { %v143_v29 = vpop.f32.mrf.mxu2  ;;  %v161_v30 = vpop.f32.mrf.mxu3 }
  0xa5   :  { %v162_v31 = vadd.f32 %v309_v28, %v161_v30  ;;  %v144_v46 = vadd.f32 %v309_v28, %v143_v29 }
  0xa7   :  { %v179_v33 = vmax.f32 %v162_v31, 0.0  ;;  %v173_v50 = vmax.f32 %v144_v46, 0.0 }
  0xa8   :  { %v128_v48 = vpop.f32.mrf.mxu0 }
  0xa9   :  { %282 = vmatpush.xpose.msk.msra.mxu1 %vm188_vm2, %v179_v33  ;;  %v129_v61 = vadd.f32 %v309_v28, %v128_v48 }
  0xab   :  { %v168_v0 = vmax.f32 %v129_v61, 0.0 }
  0xac   :  { %v146_v37 = vpop.f32.mrf.mxu2 }
  0xad   :  { %283 = vmatpush.xpose.msk.msra.mxu1 %vm188_vm2, %v178_v36  ;;  %v147_v44 = vadd.f32 %v309_v28, %v146_v37 }
  0xaf   :  { %v174_v47 = vmax.f32 %v147_v44, 0.0 }
  0xb0   :  { %v131_v53 = vpop.f32.mrf.mxu0 }
  0xb1   :  { %284 = vmatpush.xpose.msk.msra.mxu1 %vm188_vm2, %v177_v39  ;;  %v132_v57 = vadd.f32 %v309_v28, %v131_v53 }
  0xb3   :  { %v169_v60 = vmax.f32 %v132_v57, 0.0 }
  0xb4   :  { %v149_v42 = vpop.f32.mrf.mxu2 }
  0xb5   :  { %v150_v43 = vadd.f32 %v309_v28, %v149_v42  ;;  %285 = vmatpush.xpose.msk.msra.mxu1 %vm188_vm2, %v176_v41 }
  0xb7   :  { %v175_v45 = vmax.f32 %v150_v43, 0.0 }
  0xb9   :  { %286 = vmatpush.xpose.msk.msra.mxu1 %vm188_vm2, %v175_v45 }
  0xbd   :  { %287 = vmatpush.xpose.msk.msra.mxu1 %vm188_vm2, %v174_v47 }
  0xc1   :  { %288 = vmatpush.xpose.msk.msra.mxu1 %vm188_vm2, %v173_v50 }
  0xc5   :  { %289 = vmatpush.xpose.msk.msra.mxu1 %vm188_vm2, %v172_v52 }
  0xc9   :  { %290 = vmatpush.xpose.msk.msra.mxu1 %vm188_vm2, %v171_v55 }
  0xcd   :  { %291 = vmatpush.xpose.msk.msra.mxu1 %vm188_vm2, %v170_v59 }
  0xd1   :  { %292 = vmatpush.xpose.msk.msra.mxu1 %vm188_vm2, %v169_v60 }
  0xd5   :  { %293 = vmatpush.xpose.msk.msra.mxu1 %vm188_vm2, %v168_v0 }
  0xd9   :  { %294 = vmatpush.xpose.msk.msra.mxu1 %vm188_vm2, %v167_v2 }
  0xdd   :  { %295 = vmatpush.xpose.msk.msra.mxu1 %vm188_vm2, %v166_v4 }
  0xe1   :  { %296 = vmatpush.xpose.msk.msra.mxu1 %vm188_vm2, %v165_v6 }
  0xe5   :  { %297 = vmatpush.xpose.msk.msra.mxu1 %vm188_vm2, %v164_v7 }
  0xe8   :  { %298 = vmatmul.msk.f32.vlgmr.msra.gmra.mxu1 %vm188_vm2, %v180_v8 }
 0x165   :  { %v257_v11 = vpop.f32.mrf.mxu1 }
 0x166   :  { %v258_v12 = vadd.f32 %v257_v11, %v187_v10 }
 0x168   :  { %260 = vst [vmem:[%s454_s5] sm:$0x1] %v258_v12 }

</bundles_post_ra>
